<compile_context>
chip_gen: v5e
topology: v5e:2x2
jax: 0.10.0
libtpu: 0.0.40
codegen_flags: <defaults>
</compile_context>

<pallas_src>
import functools

import jax
import jax.numpy as jnp
from jax.experimental import pallas as pl
from jax.experimental.pallas import tpu as pltpu


# ----------------------------------------------------------------------------
# In-kernel helpers (trace-time functions used inside the Pallas kernel bodies)
# ----------------------------------------------------------------------------
def _l2_normalize_rows(x, eps=0.0):
    """Row-wise L2 normalize via rsqrt (EUP) + multiply (VPU).

    eps > 0 clamps the norm (F.cosine_similarity semantics); eps == 0 matches
    PyTorch's exact `x / x.norm(...)` division (0/0 -> NaN in both frameworks).
    """
    ss = jnp.sum(x * x, axis=-1, keepdims=True)
    if eps > 0.0:
        ss = jnp.maximum(ss, eps * eps)   # max(sqrt(ss), eps) == sqrt(max(ss, eps^2))
    return x * jax.lax.rsqrt(ss)


def _focal_elems(logits, probs, labels, alpha, gamma):
    """Per-element FocalLoss(alpha, gamma) with BCEWithLogits(reduction='none').

    `probs` is the already-computed sigmoid(logits) (reused, not recomputed).
    Matches PyTorch: alpha where label==1 else (1-alpha); pt = probs/1-probs.
    """
    a = jnp.where(labels == 1.0, alpha, 1.0 - alpha)
    pt = jnp.where(labels == 1.0, probs, 1.0 - probs)
    # Numerically-stable BCEWithLogitsLoss(reduction='none'):
    ce = jnp.maximum(logits, 0.0) - logits * labels + jnp.log1p(jnp.exp(-jnp.abs(logits)))
    one_m_pt = 1.0 - pt
    if float(gamma) == 2.0:
        mod = one_m_pt * one_m_pt          # avoid pow -> exp/log on the EUP
    else:
        mod = one_m_pt ** gamma
    return a * mod * ce


def _masked_candidate_mean(focal_row, n):
    """Mean of a (1, N) focal row over columns 1..N-1 (anchor column masked)."""
    col = jax.lax.broadcasted_iota(jnp.int32, focal_row.shape, 1)
    valid = (col >= 1).astype(jnp.float32)
    return jnp.sum(focal_row * valid) / float(n - 1)


# ----------------------------------------------------------------------------
# Pallas kernels (the matching-head hot paths)
# ----------------------------------------------------------------------------
def _clip_head_kernel(img_ref, wimg_ref, txt_ref, wtxt_ref, lbl_ref,
                      loss_ref, out_ref, *, alpha, gamma):
    # img: (N, Kimg) flattened image, wimg: (Kimg, D),
    # txt: (N, Dt) pooled text,       wtxt: (Dt, D),  lbl: (1, N) (col 0 = pad).
    n = img_ref.shape[0]

    # Fused encoder projections (the real MXU work).
    img_feat = jnp.dot(img_ref[...].astype(jnp.float32),
                       wimg_ref[...].astype(jnp.float32),
                       preferred_element_type=jnp.float32)            # (N, D)
    txt_feat = jnp.dot(txt_ref[...].astype(jnp.float32),
                       wtxt_ref[...].astype(jnp.float32),
                       preferred_element_type=jnp.float32)            # (N, D)

    img_n = _l2_normalize_rows(img_feat)
    txt_n = _l2_normalize_rows(txt_feat)

    # Both anchor-vs-candidate products in one MXU op:
    #   row 0 = a_img . [txt | img],  row 1 = a_txt . [txt | img]
    anchors = jnp.concatenate([img_n[0:1, :], txt_n[0:1, :]], axis=0)  # (2, D)
    feats = jnp.concatenate([txt_n, img_n], axis=0)                    # (2N, D)
    s = jax.lax.dot_general(anchors, feats, (((1,), (1,)), ((), ())),
                            preferred_element_type=jnp.float32)        # (2, 2N)
    logits_i = s[0:1, :n]      # a_img . txt_feat  (logits_per_image), (1, N)
    logits_t = s[1:2, n:]      # a_txt . img_feat  (logits_per_text),  (1, N)
    logit_sum = logits_i + logits_t

    # One EUP pass over all three sigmoid rows.
    sig = jax.nn.sigmoid(jnp.concatenate([logits_i, logits_t, logit_sum], axis=0))
    sig_i, sig_t, probs_sum = sig[0:1, :], sig[1:2, :], sig[2:3, :]

    # Packed lane-dense output block:
    #   row 0 = sigmoid(li) + sigmoid(lt)   (PyTorch `logits`, returned in training)
    #   row 1 = sigmoid(logits_per_image)   (eval output)
    #   row 2 = sigmoid(logits_per_text)    (eval output)
    out_ref[...] = jnp.concatenate([sig_i + sig_t, sig_i, sig_t], axis=0)

    # FocalLoss on the RAW logit sum (matches PyTorch: loss_fn(li + lt, labels)),
    # reusing the already-computed sigmoid; anchor column masked out.
    focal = _focal_elems(logit_sum, probs_sum, lbl_ref[...], alpha, gamma)
    loss_ref[0] = _masked_candidate_mean(focal, n)


def _cross_head_kernel(feat_ref, w_ref, b_ref, lbl_ref,
                       loss_ref, sig_ref, *, alpha, gamma):
    # feat: (N, D), w: (1, D) classifier row, b: (1,) SMEM scalar, lbl: (1, N).
    feat = feat_ref[...].astype(jnp.float32)
    w = w_ref[...].astype(jnp.float32)
    # Lane-dense scores: (1, D) x (N, D) contracting D -> (1, N).
    scores = jax.lax.dot_general(w, feat, (((1,), (1,)), ((), ())),
                                 preferred_element_type=jnp.float32)
    scores = scores + b_ref[0]
    probs = jax.nn.sigmoid(scores)
    sig_ref[...] = probs
    focal = _focal_elems(scores, probs, lbl_ref[...], alpha, gamma)
    loss_ref[0] = jnp.mean(focal)


def _bi_body(feat, lbl, loss_ref, sig_ref, eps, alpha, gamma):
    # feat: (N, D) with row 0 = anchor, lbl: (1, N) with col 0 = pad.
    n = feat.shape[0]
    fn = _l2_normalize_rows(feat, eps)
    anchor = fn[0:1, :]                                                # (1, D)
    scores = jax.lax.dot_general(anchor, fn, (((1,), (1,)), ((), ())),
                                 preferred_element_type=jnp.float32)   # (1, N)
    probs = jax.nn.sigmoid(scores)
    sig_ref[...] = probs
    focal = _focal_elems(scores, probs, lbl, alpha, gamma)
    loss_ref[0] = _masked_candidate_mean(focal, n)


def _bi_head_kernel(feat_ref, lbl_ref, loss_ref, sig_ref, *, eps, alpha, gamma):
    _bi_body(feat_ref[...].astype(jnp.float32), lbl_ref[...],
             loss_ref, sig_ref, eps, alpha, gamma)


def _bi_proj_head_kernel(x_ref, w_ref, lbl_ref, loss_ref, sig_ref,
                         *, eps, alpha, gamma):
    # Fused image projection: (N, Kimg) @ (Kimg, D) -> (N, D), then bi head.
    feat = jnp.dot(x_ref[...].astype(jnp.float32), w_ref[...].astype(jnp.float32),
                   preferred_element_type=jnp.float32)
    _bi_body(feat, lbl_ref[...], loss_ref, sig_ref, eps, alpha, gamma)


# ----------------------------------------------------------------------------
# pallas_call wrappers
# ----------------------------------------------------------------------------
def _vmem_spec():
    return pl.BlockSpec(memory_space=pltpu.MemorySpace.VMEM)


def _smem_spec():
    return pl.BlockSpec(memory_space=pltpu.MemorySpace.SMEM)


def _pad_candidate_labels(labels, n):
    # (N-1,) candidate labels -> (1, N) row with a zero in the (masked) anchor col.
    return jnp.pad(labels.astype(jnp.float32).reshape(1, n - 1), ((0, 0), (1, 0)))


def clip_head(img_flat, w_img, txt_pooled, w_txt, labels, *, alpha=0.96, gamma=2.0):
    n = img_flat.shape[0]
    lbl = _pad_candidate_labels(labels, n)
    kern = functools.partial(_clip_head_kernel, alpha=alpha, gamma=gamma)
    loss, packed = pl.pallas_call(
        kern,
        in_specs=[_vmem_spec()] * 5,
        out_specs=(_smem_spec(), _vmem_spec()),
        out_shape=(jax.ShapeDtypeStruct((1,), jnp.float32),
                   jax.ShapeDtypeStruct((3, n), jnp.float32)),
    )(img_flat, w_img, txt_pooled, w_txt, lbl)
    # Candidate columns only (drop the masked anchor column 0).
    return loss[0], packed[0, 1:], packed[1, 1:], packed[2, 1:]


def cross_head(feat, w_row, b, labels, *, alpha=0.96, gamma=2.0):
    n = feat.shape[0]
    lbl = labels.astype(jnp.float32).reshape(1, n)
    kern = functools.partial(_cross_head_kernel, alpha=alpha, gamma=gamma)
    loss, sig = pl.pallas_call(
        kern,
        in_specs=[_vmem_spec(), _vmem_spec(), _smem_spec(), _vmem_spec()],
        out_specs=(_smem_spec(), _vmem_spec()),
        out_shape=(jax.ShapeDtypeStruct((1,), jnp.float32),
                   jax.ShapeDtypeStruct((1, n), jnp.float32)),
    )(feat, w_row, b, lbl)
    return loss[0], sig[0]


def bi_head(feat, labels, *, eps=0.0, alpha=0.96, gamma=2.0):
    n = feat.shape[0]
    lbl = _pad_candidate_labels(labels, n)
    kern = functools.partial(_bi_head_kernel, eps=eps, alpha=alpha, gamma=gamma)
    loss, sig = pl.pallas_call(
        kern,
        in_specs=[_vmem_spec(), _vmem_spec()],
        out_specs=(_smem_spec(), _vmem_spec()),
        out_shape=(jax.ShapeDtypeStruct((1,), jnp.float32),
                   jax.ShapeDtypeStruct((1, n), jnp.float32)),
    )(feat, lbl)
    return loss[0], sig[0, 1:]


def bi_proj_head(x_flat, w, labels, *, eps=1e-5, alpha=0.96, gamma=2.0):
    n = x_flat.shape[0]
    lbl = _pad_candidate_labels(labels, n)
    kern = functools.partial(_bi_proj_head_kernel, eps=eps, alpha=alpha, gamma=gamma)
    loss, sig = pl.pallas_call(
        kern,
        in_specs=[_vmem_spec(), _vmem_spec(), _vmem_spec()],
        out_specs=(_smem_spec(), _vmem_spec()),
        out_shape=(jax.ShapeDtypeStruct((1,), jnp.float32),
                   jax.ShapeDtypeStruct((1, n), jnp.float32)),
    )(x_flat, w, lbl)
    return loss[0], sig[0, 1:]


# ----------------------------------------------------------------------------
# MatchingModel (plain-JAX glue + Pallas heads)
# ----------------------------------------------------------------------------
class Args:
    def __init__(self, model='clip', loss='focal', encoder='clip'):
        self.model = model
        self.loss = loss
        self.encoder = encoder


class MatchingModel:
    def __init__(self, args, key, *, d_feat=32, d_text=32, vocab=100,
                 img_c=3, img_hw=16):
        self.args = args
        if self.args.loss == 'focal':
            self.alpha, self.gamma = 0.96, 2.0
        elif self.args.loss == 'bce':
            # TODO(synk): BCEWithLogitsLoss(reduction='none') heads (incl. the
            # clip-path pos/neg weighted combination) not wired into the Pallas
            # heads; only the 'focal' loss path is implemented.
            raise NotImplementedError("only args.loss == 'focal' is implemented")

        # TODO(synk): pretrained BERT-base / ResNet-152 / CLIP ViT-B/16 backbones
        # are not translatable from this module; replaced with deterministic
        # embedding / linear stand-ins producing (N, D) feature rows.
        k0, k1, k2, k3 = jax.random.split(key, 4)
        self.emb = (jax.random.normal(k0, (vocab, d_text)) * 0.02).astype(jnp.float32)
        self.w_img = (jax.random.normal(k1, (img_c * img_hw * img_hw, d_feat)) * 0.02
                      ).astype(jnp.float32)
        self.w_txt = (jax.random.normal(k2, (d_text, d_feat)) * 0.02).astype(jnp.float32)
        # classifier: nn.Linear(768, 1) in the original; stored as a (1, d_text)
        # row so the in-kernel score matmul is lane-dense.
        self.cls_w = (jax.random.normal(k3, (1, d_text)) * 0.02).astype(jnp.float32)
        self.cls_b = jnp.zeros((1,), jnp.float32)

    # ---- encoder stand-ins (plain-JAX glue; embedding gather stays outside Pallas)
    def _encode_text(self, gloss, mask=None):
        # gloss: (N, L) int token ids -> (N, d_text) masked mean-pooled embeddings.
        e = self.emb[gloss]                                  # (N, L, d_text)
        if mask is None:
            return jnp.mean(e, axis=1)
        m = mask.astype(jnp.float32)[..., None]              # (N, L, 1)
        return jnp.sum(e * m, axis=1) / jnp.maximum(jnp.sum(m, axis=1), 1.0)

    @staticmethod
    def _flatten_image(image):
        # image: (N, C, H, W) NCHW -> (N, C*H*W); projection happens in-kernel.
        return image.reshape(image.shape[0], -1)

    # ---- forward dispatch (mirrors MatchingModel.forward) ----
    def forward(self, gloss=None, image=None, gloss_attention_mask=None,
                labels=None, to_squeeze=True, training=False):
        if self.args.model == 'text_cross_encoder':
            return self.text_cross_encoder(gloss, gloss_attention_mask, labels,
                                           to_squeeze, training)
        elif self.args.model == 'text_bi_encoder':
            return self.text_bi_encoder(gloss, gloss_attention_mask, labels,
                                        to_squeeze, training)
        elif self.args.model == 'image_bi_encoder':
            return self.image_bi_encoder(gloss, image, gloss_attention_mask,
                                         labels, to_squeeze, training)
        elif self.args.model == 'clip':
            return self.clip_encoder(gloss, image, gloss_attention_mask,
                                     labels, to_squeeze, training)
        else:
            raise Exception('No such model')

    def text_cross_encoder(self, gloss, mask, labels, to_squeeze, training):
        if to_squeeze:
            gloss = jnp.squeeze(gloss, axis=0)
            mask = jnp.squeeze(mask, axis=0)
            labels = jnp.squeeze(labels, axis=0) if labels is not None else None
        feat = self._encode_text(gloss, mask)                # (N, d_text)
        lbl = labels if labels is not None else jnp.zeros((feat.shape[0],), jnp.float32)
        loss, sig = cross_head(feat, self.cls_w, self.cls_b, lbl,
                               alpha=self.alpha, gamma=self.gamma)
        return (loss, sig) if training else sig

    def text_bi_encoder(self, gloss, mask, labels, to_squeeze, training):
        if to_squeeze:
            gloss = jnp.squeeze(gloss, axis=0)
            mask = jnp.squeeze(mask, axis=0)
            labels = jnp.squeeze(labels, axis=0) if labels is not None else None
        feat = self._encode_text(gloss, mask)                # (N, d_text)
        lbl = labels if labels is not None else jnp.zeros((feat.shape[0] - 1,), jnp.float32)
        # eps=0 matches PyTorch's exact `x / x.norm()` (NaN on an all-zero row there too).
        loss, sig = bi_head(feat, lbl, eps=0.0, alpha=self.alpha, gamma=self.gamma)
        return (loss, sig) if training else sig

    def image_bi_encoder(self, gloss, image, mask, labels, to_squeeze, training):
        if to_squeeze:
            image = jnp.squeeze(image, axis=0)
            labels = jnp.squeeze(labels, axis=0) if labels is not None else None
        x_flat = self._flatten_image(image)                  # (N, C*H*W)
        lbl = labels if labels is not None else jnp.zeros((x_flat.shape[0] - 1,), jnp.float32)
        # F.cosine_similarity(..., eps=1e-5) == normalized dot with eps-clamped norms.
        loss, sig = bi_proj_head(x_flat, self.w_img, lbl, eps=1e-5,
                                 alpha=self.alpha, gamma=self.gamma)
        return (loss, sig) if training else sig

    def clip_encoder(self, gloss, image, mask, labels, to_squeeze, training):
        if to_squeeze:
            gloss = jnp.squeeze(gloss, axis=0)
            image = jnp.squeeze(image, axis=0)
            labels = jnp.squeeze(labels, axis=0) if labels is not None else None
        x_flat = self._flatten_image(image)                  # (N, C*H*W)
        txt_pooled = self._encode_text(gloss)                # (N, d_text)
        lbl = labels if labels is not None else jnp.zeros((x_flat.shape[0] - 1,), jnp.float32)
        loss, logits, sig_i, sig_t = clip_head(x_flat, self.w_img, txt_pooled, self.w_txt,
                                               lbl, alpha=self.alpha, gamma=self.gamma)
        if training:
            # `logits` = sigmoid(logits_per_image) + sigmoid(logits_per_text),
            # loss uses the raw logit sum — both exactly as in the PyTorch module.
            return loss, logits
        return sig_i, sig_t


# ----------------------------------------------------------------------------
# Demo / smoke test
# ----------------------------------------------------------------------------
if __name__ == "__main__":
    key = jax.random.PRNGKey(0)
    k1, k2, k3, k4 = jax.random.split(key, 4)

    N, L, C, HW = 9, 8, 3, 16          # 1 anchor + 8 candidates
    gloss = jax.random.randint(k1, (1, N, L), 0, 100, dtype=jnp.int32)
    mask = jnp.ones((1, N, L), jnp.int32)
    image = jax.random.normal(k2, (1, N, C, HW, HW), jnp.float32)
    labels_cand = (jax.random.uniform(k3, (1, N - 1)) > 0.5).astype(jnp.float32)
    labels_all = (jax.random.uniform(k4, (1, N)) > 0.5).astype(jnp.float32)

    # clip path (training + eval)
    m_clip = MatchingModel(Args(model='clip', loss='focal', encoder='clip'),
                           jax.random.PRNGKey(42))
    clip_loss, clip_logits = m_clip.forward(gloss=gloss, image=image,
                                            labels=labels_cand, training=True)
    sig_i, sig_t = m_clip.forward(gloss=gloss, image=image, training=False)

    # text cross-encoder path (training)
    m_cross = MatchingModel(Args(model='text_cross_encoder', loss='focal', encoder='br'),
                            jax.random.PRNGKey(42))
    cross_loss, cross_sig = m_cross.forward(gloss=gloss, gloss_attention_mask=mask,
                                            labels=labels_all, training=True)

    # text bi-encoder path (eval)
    m_tbi = MatchingModel(Args(model='text_bi_encoder', loss='focal', encoder='br'),
                          jax.random.PRNGKey(42))
    tbi_sig = m_tbi.forward(gloss=gloss, gloss_attention_mask=mask,
                            labels=labels_cand, training=False)

    # image bi-encoder path (eval)
    m_ibi = MatchingModel(Args(model='image_bi_encoder', loss='focal', encoder='br'),
                          jax.random.PRNGKey(42))
    ibi_sig = m_ibi.forward(gloss=gloss, image=image, gloss_attention_mask=mask,
                            labels=labels_cand, training=False)

    outs = jax.block_until_ready(
        (clip_loss, clip_logits, sig_i, sig_t, cross_loss, cross_sig, tbi_sig, ibi_sig))

    assert outs[1].shape == (N - 1,) and outs[2].shape == (N - 1,) and outs[3].shape == (N - 1,)
    assert outs[5].shape == (N,) and outs[6].shape == (N - 1,) and outs[7].shape == (N - 1,)
    assert all(bool(jnp.isfinite(jnp.asarray(o)).all()) for o in outs)
    print("KERNEL_OK")
</pallas_src>

<mosaic_0001>
module attributes {stable_mosaic.version = 11 : i64} {
  func.func @_clip_head_kernel(%arg0: memref<9x768xf32, #tpu.memory_space<vmem>>, %arg1: memref<768x32xf32, #tpu.memory_space<vmem>>, %arg2: memref<9x32xf32, #tpu.memory_space<vmem>>, %arg3: memref<32x32xf32, #tpu.memory_space<vmem>>, %arg4: memref<1x9xf32, #tpu.memory_space<vmem>>, %arg5: memref<1xf32, #tpu.memory_space<smem>>, %arg6: memref<3x9xf32, #tpu.memory_space<vmem>>) attributes {dimension_semantics = [], scalar_prefetch = 0 : i64, scratch_operands = 0 : i64, tpu.core_type = #tpu.core_type<tc>} {
    %c0 = arith.constant 0 : index
    %c0_0 = arith.constant 0 : index
    %0 = vector.load %arg0[%c0, %c0_0] : memref<9x768xf32, #tpu.memory_space<vmem>>, vector<9x768xf32>
    %c0_1 = arith.constant 0 : index
    %c0_2 = arith.constant 0 : index
    %1 = vector.load %arg1[%c0_1, %c0_2] : memref<768x32xf32, #tpu.memory_space<vmem>>, vector<768x32xf32>
    %cst = arith.constant dense<0.000000e+00> : vector<9x32xf32>
    %2 = tpu.matmul %0, %1, %cst {dimension_numbers = #tpu.dot_dimension_numbers<[1], [0], [0], [1], [0, 0, 1, 1], [], []>} : vector<9x768xf32>, vector<768x32xf32>, vector<9x32xf32> -> vector<9x32xf32>
    %c0_3 = arith.constant 0 : index
    %c0_4 = arith.constant 0 : index
    %3 = vector.load %arg2[%c0_3, %c0_4] : memref<9x32xf32, #tpu.memory_space<vmem>>, vector<9x32xf32>
    %c0_5 = arith.constant 0 : index
    %c0_6 = arith.constant 0 : index
    %4 = vector.load %arg3[%c0_5, %c0_6] : memref<32x32xf32, #tpu.memory_space<vmem>>, vector<32x32xf32>
    %cst_7 = arith.constant dense<0.000000e+00> : vector<9x32xf32>
    %5 = tpu.matmul %3, %4, %cst_7 {dimension_numbers = #tpu.dot_dimension_numbers<[1], [0], [0], [1], [0, 0, 1, 1], [], []>} : vector<9x32xf32>, vector<32x32xf32>, vector<9x32xf32> -> vector<9x32xf32>
    %6 = arith.mulf %2, %2 : vector<9x32xf32>
    %cst_8 = arith.constant dense<0.000000e+00> : vector<9xf32>
    %7 = vector.multi_reduction <add>, %6, %cst_8 [1] : vector<9x32xf32> to vector<9xf32>
    %8 = vector.shape_cast %7 : vector<9xf32> to vector<9x1xf32>
    %9 = math.rsqrt %8 : vector<9x1xf32>
    %10 = vector.broadcast %9 : vector<9x1xf32> to vector<9x32xf32>
    %11 = arith.mulf %2, %10 : vector<9x32xf32>
    %12 = arith.mulf %5, %5 : vector<9x32xf32>
    %cst_9 = arith.constant dense<0.000000e+00> : vector<9xf32>
    %13 = vector.multi_reduction <add>, %12, %cst_9 [1] : vector<9x32xf32> to vector<9xf32>
    %14 = vector.shape_cast %13 : vector<9xf32> to vector<9x1xf32>
    %15 = math.rsqrt %14 : vector<9x1xf32>
    %16 = vector.broadcast %15 : vector<9x1xf32> to vector<9x32xf32>
    %17 = arith.mulf %5, %16 : vector<9x32xf32>
    %18 = vector.extract_strided_slice %11 {offsets = [0, 0], sizes = [1, 32], strides = [1, 1]} : vector<9x32xf32> to vector<1x32xf32>
    %19 = vector.extract_strided_slice %17 {offsets = [0, 0], sizes = [1, 32], strides = [1, 1]} : vector<9x32xf32> to vector<1x32xf32>
    %20 = tpu.concatenate %18, %19 in 0 : vector<1x32xf32>, vector<1x32xf32> -> vector<2x32xf32>
    %21 = tpu.concatenate %17, %11 in 0 : vector<9x32xf32>, vector<9x32xf32> -> vector<18x32xf32>
    %cst_10 = arith.constant dense<0.000000e+00> : vector<2x18xf32>
    %22 = tpu.matmul %20, %21, %cst_10 {dimension_numbers = #tpu.dot_dimension_numbers<[1], [1], [0], [0], [0, 0, 1, 0], [], []>} : vector<2x32xf32>, vector<18x32xf32>, vector<2x18xf32> -> vector<2x18xf32>
    %23 = vector.extract_strided_slice %22 {offsets = [0, 0], sizes = [1, 9], strides = [1, 1]} : vector<2x18xf32> to vector<1x9xf32>
    %24 = vector.extract_strided_slice %22 {offsets = [1, 9], sizes = [1, 9], strides = [1, 1]} : vector<2x18xf32> to vector<1x9xf32>
    %25 = arith.addf %23, %24 : vector<1x9xf32>
    %26 = tpu.concatenate %23, %24, %25 in 0 : vector<1x9xf32>, vector<1x9xf32>, vector<1x9xf32> -> vector<3x9xf32>
    %27 = arith.negf %26 : vector<3x9xf32>
    %28 = math.exp %27 : vector<3x9xf32>
    %cst_11 = arith.constant 1.000000e+00 : f32
    %29 = vector.broadcast %cst_11 : f32 to vector<3x9xf32>
    %30 = arith.addf %29, %28 : vector<3x9xf32>
    %31 = arith.divf %29, %30 : vector<3x9xf32>
    %32 = vector.extract_strided_slice %31 {offsets = [0, 0], sizes = [1, 9], strides = [1, 1]} : vector<3x9xf32> to vector<1x9xf32>
    %33 = vector.extract_strided_slice %31 {offsets = [1, 0], sizes = [1, 9], strides = [1, 1]} : vector<3x9xf32> to vector<1x9xf32>
    %34 = vector.extract_strided_slice %31 {offsets = [2, 0], sizes = [1, 9], strides = [1, 1]} : vector<3x9xf32> to vector<1x9xf32>
    %35 = arith.addf %32, %33 : vector<1x9xf32>
    %36 = tpu.concatenate %35, %32, %33 in 0 : vector<1x9xf32>, vector<1x9xf32>, vector<1x9xf32> -> vector<3x9xf32>
    %c0_12 = arith.constant 0 : index
    %c0_13 = arith.constant 0 : index
    %37 = vector.load %arg6[%c0_12, %c0_13] : memref<3x9xf32, #tpu.memory_space<vmem>>, vector<3x9xf32>
    tpu.vector_store %arg6[%c0_12, %c0_13], %36 {strides = array<i32>} : memref<3x9xf32, #tpu.memory_space<vmem>>, vector<3x9xf32>,
    %c0_14 = arith.constant 0 : index
    %c0_15 = arith.constant 0 : index
    %38 = vector.load %arg4[%c0_14, %c0_15] : memref<1x9xf32, #tpu.memory_space<vmem>>, vector<1x9xf32>
    %cst_16 = arith.constant 1.000000e+00 : f32
    %39 = vector.broadcast %cst_16 : f32 to vector<1x9xf32>
    %40 = arith.cmpf oeq, %38, %39 : vector<1x9xf32>
    %cst_17 = arith.constant 0.959999978 : f32
    %cst_18 = arith.constant 4.000000e-02 : f32
    %41 = vector.broadcast %cst_17 : f32 to vector<1x9xf32>
    %42 = vector.broadcast %cst_18 : f32 to vector<1x9xf32>
    %43 = arith.select %40, %41, %42 : vector<1x9xi1>, vector<1x9xf32>
    %cst_19 = arith.constant 1.000000e+00 : f32
    %44 = vector.broadcast %cst_19 : f32 to vector<1x9xf32>
    %45 = arith.cmpf oeq, %38, %44 : vector<1x9xf32>
    %cst_20 = arith.constant 1.000000e+00 : f32
    %46 = vector.broadcast %cst_20 : f32 to vector<1x9xf32>
    %47 = arith.subf %46, %34 : vector<1x9xf32>
    %48 = arith.select %45, %34, %47 : vector<1x9xi1>, vector<1x9xf32>
    %cst_21 = arith.constant 0.000000e+00 : f32
    %49 = vector.broadcast %cst_21 : f32 to vector<1x9xf32>
    %50 = arith.maximumf %25, %49 : vector<1x9xf32>
    %51 = arith.mulf %25, %38 : vector<1x9xf32>
    %52 = arith.subf %50, %51 : vector<1x9xf32>
    %53 = math.absf %25 : vector<1x9xf32>
    %cst_22 = arith.constant 0.000000e+00 : f32
    %54 = vector.broadcast %cst_22 : f32 to vector<1x9xf32>
    %55 = arith.subf %54, %53 : vector<1x9xf32>
    %56 = math.exp %55 : vector<1x9xf32>
    %57 = math.log1p %56 : vector<1x9xf32>
    %58 = arith.addf %52, %57 : vector<1x9xf32>
    %cst_23 = arith.constant 1.000000e+00 : f32
    %59 = vector.broadcast %cst_23 : f32 to vector<1x9xf32>
    %60 = arith.subf %59, %48 : vector<1x9xf32>
    %61 = arith.mulf %60, %60 : vector<1x9xf32>
    %62 = arith.mulf %43, %61 : vector<1x9xf32>
    %63 = arith.mulf %62, %58 : vector<1x9xf32>
    %64 = tpu.iota {dimensions = array<i32: 1>} : vector<1x9xi32>
    %c1_i32 = arith.constant 1 : i32
    %65 = vector.broadcast %c1_i32 : i32 to vector<1x9xi32>
    %66 = arith.cmpi sge, %64, %65 : vector<1x9xi32>
    %67 = arith.extui %66 : vector<1x9xi1> to vector<1x9xi32>
    %68 = arith.sitofp %67 : vector<1x9xi32> to vector<1x9xf32>
    %69 = arith.mulf %63, %68 : vector<1x9xf32>
    %70 = vector.shape_cast %69 : vector<1x9xf32> to vector<1x1x9xf32>
    %cst_24 = arith.constant dense<0.000000e+00> : vector<1xf32>
    %71 = vector.multi_reduction <add>, %70, %cst_24 [1, 2] : vector<1x1x9xf32> to vector<1xf32>
    %72 = vector.shape_cast %71 : vector<1xf32> to vector<1x1x1xf32>
    %73 = vector.extract %72[0, 0, 0] : f32 from vector<1x1x1xf32>
    %cst_25 = arith.constant 8.000000e+00 : f32
    %74 = arith.divf %73, %cst_25 : f32
    %c0_26 = arith.constant 0 : index
    %75 = memref.load %arg5[%c0_26] : memref<1xf32, #tpu.memory_space<smem>>
    memref.store %74, %arg5[%c0_26] : memref<1xf32, #tpu.memory_space<smem>>
    return
  }
}

</mosaic_0001>

<bundles_post_ra>
// kernel: tpu_custom_call.1
= control target key start
LH: loop header
LB: loop body
LE: loop exit
PB: predicated region body
PF: predicated region fallthrough
CT: control target
= control target key end

     0   :  { %12 = vsyncpa [#allocation4], 0  ;;  %s1048_s0 = inlined_call_operand.vmem [shape: f32[9,768], index: 0, kind: input, shape index: {}]   ;;  %s1049_s1 = inlined_call_operand.vmem [shape: f32[768,32], index: 1, kind: input, shape index: {}]   ;;  %s1050_s2 = inlined_call_operand.vmem [shape: f32[9,32], index: 2, kind: input, shape index: {}]   ;;  %s1051_s3 = inlined_call_operand.vmem [shape: f32[32,32], index: 3, kind: input, shape index: {}]   ;;  %s1052_s4 = inlined_call_operand.vmem [shape: f32[1,9], index: 4, kind: input, shape index: {}]   ;;  %s1053_s5 = inlined_call_operand.hbm [shape: f32[1], index: 5, kind: output, shape index: {0}]   ;;  %s1054_s6 = inlined_call_operand.hbm [shape: f32[3,9], index: 6, kind: output, shape index: {1}]  }
   0x1   :  { %v51_v0 = vld [vmem:[%s1049_s1 + $0x78] sm:$0xff]  ;;  %v50_v2 = vld [vmem:[%s1049_s1 + $0x70] sm:$0xff]  ;;  %v49_v5 = vld [vmem:[%s1049_s1 + $0x68] sm:$0xff] }
   0x2   :  { %v83_v1 = vld [vmem:[%s1049_s1 + $0x178] sm:$0xff]  ;;  %132 = vmatpush.msra.mxu0 %v51_v0  ;;  %v82_v4 = vld [vmem:[%s1049_s1 + $0x170] sm:$0xff]  ;;  %v81_v7 = vld [vmem:[%s1049_s1 + $0x168] sm:$0xff] }
   0x3   :  { %178 = vmatpush.msra.mxu2 %v83_v1  ;;  %v67_v3 = vld [vmem:[%s1049_s1 + $0xf8] sm:$0xff]  ;;  %v66_v6 = vld [vmem:[%s1049_s1 + $0xf0] sm:$0xff]  ;;  %v65_v8 = vld [vmem:[%s1049_s1 + $0xe8] sm:$0xff] }
   0x4   :  { %155 = vmatpush.msra.mxu1 %v67_v3  ;;  %133 = vmatpush.msra.mxu0 %v50_v2  ;;  %v48_v9 = vld [vmem:[%s1049_s1 + $0x60] sm:$0xff]  ;;  %v47_v12 = vld [vmem:[%s1049_s1 + $0x58] sm:$0xff]  ;;  %v46_v16 = vld [vmem:[%s1049_s1 + $0x50] sm:$0xff] }
   0x5   :  { %179 = vmatpush.msra.mxu2 %v82_v4  ;;  %v80_v10 = vld [vmem:[%s1049_s1 + $0x160] sm:$0xff]  ;;  %v79_v13 = vld [vmem:[%s1049_s1 + $0x158] sm:$0xff]  ;;  %v78_v17 = vld [vmem:[%s1049_s1 + $0x150] sm:$0xff] }
   0x6   :  { %156 = vmatpush.msra.mxu1 %v66_v6  ;;  %134 = vmatpush.msra.mxu0 %v49_v5  ;;  %v64_v11 = vld [vmem:[%s1049_s1 + $0xe0] sm:$0xff]  ;;  %v99_v14 = vld [vmem:[%s1049_s1 + $0x1f8] sm:$0xff]  ;;  %v98_v18 = vld [vmem:[%s1049_s1 + $0x1f0] sm:$0xff] }
   0x7   :  { %180 = vmatpush.msra.mxu2 %v81_v7  ;;  %v63_v15 = vld [vmem:[%s1049_s1 + $0xd8] sm:$0xff]  ;;  %201 = vmatpush.msra.mxu3 %v99_v14  ;;  %v62_v19 = vld [vmem:[%s1049_s1 + $0xd0] sm:$0xff]  ;;  %v97_v20 = vld [vmem:[%s1049_s1 + $0x1e8] sm:$0xff] }
   0x8   :  { %157 = vmatpush.msra.mxu1 %v65_v8  ;;  %135 = vmatpush.msra.mxu0 %v48_v9  ;;  %v45_v21 = vld [vmem:[%s1049_s1 + $0x48] sm:$0xff]  ;;  %v96_v24 = vld [vmem:[%s1049_s1 + $0x1e0] sm:$0xff]  ;;  %v95_v28 = vld [vmem:[%s1049_s1 + $0x1d8] sm:$0xff] }
   0x9   :  { %181 = vmatpush.msra.mxu2 %v80_v10  ;;  %v77_v22 = vld [vmem:[%s1049_s1 + $0x148] sm:$0xff]  ;;  %202 = vmatpush.msra.mxu3 %v98_v18  ;;  %v44_v25 = vld [vmem:[%s1049_s1 + $0x40] sm:$0xff]  ;;  %v43_v29 = vld [vmem:[%s1049_s1 + $0x38] sm:$0xff] }
   0xa   :  { %158 = vmatpush.msra.mxu1 %v64_v11  ;;  %136 = vmatpush.msra.mxu0 %v47_v12  ;;  %v61_v23 = vld [vmem:[%s1049_s1 + $0xc8] sm:$0xff]  ;;  %v76_v26 = vld [vmem:[%s1049_s1 + $0x140] sm:$0xff]  ;;  %v75_v30 = vld [vmem:[%s1049_s1 + $0x138] sm:$0xff] }
   0xb   :  { %182 = vmatpush.msra.mxu2 %v79_v13  ;;  %203 = vmatpush.msra.mxu3 %v97_v20  ;;  %v60_v27 = vld [vmem:[%s1049_s1 + $0xc0] sm:$0xff]  ;;  %v59_v31 = vld [vmem:[%s1049_s1 + $0xb8] sm:$0xff]  ;;  %v94_v32 = vld [vmem:[%s1049_s1 + $0x1d0] sm:$0xff] }
   0xc   :  { %159 = vmatpush.msra.mxu1 %v63_v15  ;;  %137 = vmatpush.msra.mxu0 %v46_v16  ;;  %v42_v33 = vld [vmem:[%s1049_s1 + $0x30] sm:$0xff]  ;;  %v93_v36 = vld [vmem:[%s1049_s1 + $0x1c8] sm:$0xff]  ;;  %v92_v40 = vld [vmem:[%s1049_s1 + $0x1c0] sm:$0xff] }
   0xd   :  { %183 = vmatpush.msra.mxu2 %v78_v17  ;;  %204 = vmatpush.msra.mxu3 %v96_v24  ;;  %v74_v34 = vld [vmem:[%s1049_s1 + $0x130] sm:$0xff]  ;;  %v41_v37 = vld [vmem:[%s1049_s1 + $0x28] sm:$0xff]  ;;  %v40_v41 = vld [vmem:[%s1049_s1 + $0x20] sm:$0xff] }
   0xe   :  { %160 = vmatpush.msra.mxu1 %v62_v19  ;;  %138 = vmatpush.msra.mxu0 %v45_v21  ;;  %v58_v35 = vld [vmem:[%s1049_s1 + $0xb0] sm:$0xff]  ;;  %v73_v38 = vld [vmem:[%s1049_s1 + $0x128] sm:$0xff]  ;;  %v72_v42 = vld [vmem:[%s1049_s1 + $0x120] sm:$0xff] }
   0xf   :  { %184 = vmatpush.msra.mxu2 %v77_v22  ;;  %205 = vmatpush.msra.mxu3 %v95_v28  ;;  %v57_v39 = vld [vmem:[%s1049_s1 + $0xa8] sm:$0xff]  ;;  %v56_v43 = vld [vmem:[%s1049_s1 + $0xa0] sm:$0xff]  ;;  %v91_v44 = vld [vmem:[%s1049_s1 + $0x1b8] sm:$0xff] }
  0x10   :  { %161 = vmatpush.msra.mxu1 %v61_v23  ;;  %139 = vmatpush.msra.mxu0 %v44_v25  ;;  %v39_v45 = vld [vmem:[%s1049_s1 + $0x18] sm:$0xff]  ;;  %v90_v48 = vld [vmem:[%s1049_s1 + $0x1b0] sm:$0xff]  ;;  %v89_v52 = vld [vmem:[%s1049_s1 + $0x1a8] sm:$0xff] }
  0x11   :  { %185 = vmatpush.msra.mxu2 %v76_v26  ;;  %206 = vmatpush.msra.mxu3 %v94_v32  ;;  %v71_v46 = vld [vmem:[%s1049_s1 + $0x118] sm:$0xff]  ;;  %v38_v49 = vld [vmem:[%s1049_s1 + $0x10] sm:$0xff]  ;;  %v37_v53 = vld [vmem:[%s1049_s1 + $0x8] sm:$0xff] }
  0x12   :  { %162 = vmatpush.msra.mxu1 %v60_v27  ;;  %140 = vmatpush.msra.mxu0 %v43_v29  ;;  %v55_v47 = vld [vmem:[%s1049_s1 + $0x98] sm:$0xff]  ;;  %v70_v50 = vld [vmem:[%s1049_s1 + $0x110] sm:$0xff]  ;;  %v69_v54 = vld [vmem:[%s1049_s1 + $0x108] sm:$0xff] }
  0x13   :  { %186 = vmatpush.msra.mxu2 %v75_v30  ;;  %207 = vmatpush.msra.mxu3 %v93_v36  ;;  %v54_v51 = vld [vmem:[%s1049_s1 + $0x90] sm:$0xff]  ;;  %v53_v55 = vld [vmem:[%s1049_s1 + $0x88] sm:$0xff]  ;;  %v88_v56 = vld [vmem:[%s1049_s1 + $0x1a0] sm:$0xff] }
  0x14   :  { %163 = vmatpush.msra.mxu1 %v59_v31  ;;  %141 = vmatpush.msra.mxu0 %v42_v33  ;;  %v36_v57 = vld [vmem:[%s1049_s1] sm:$0xff]  ;;  %v26_v59 = vld [vmem:[%s1048_s0 + $0x10] sm:$0xff]  ;;  %v115_v60 = vld [vmem:[%s1049_s1 + $0x278] sm:$0xff] }
  0x15   :  { %187 = vmatpush.msra.mxu2 %v74_v34  ;;  %208 = vmatpush.msra.mxu3 %v92_v40  ;;  %v68_v58 = vld [vmem:[%s1049_s1 + $0x100] sm:$0xff]  ;;  %v87_v62 = vld [vmem:[%s1049_s1 + $0x198] sm:$0xff]  ;;  %v114_v63 = vld [vmem:[%s1049_s1 + $0x270] sm:$0xff] }
  0x16   :  { %164 = vmatpush.msra.mxu1 %v58_v35  ;;  %142 = vmatpush.msra.mxu0 %v41_v37  ;;  %v52_v61 = vld [vmem:[%s1049_s1 + $0x80] sm:$0xff]  ;;  %v131_v0 = vld [vmem:[%s1049_s1 + $0x2f8] sm:$0xff]  ;;  %v86_v1 = vld [vmem:[%s1049_s1 + $0x190] sm:$0xff] }
  0x17   :  { %188 = vmatpush.msra.mxu2 %v73_v38  ;;  %209 = vmatpush.msra.mxu3 %v91_v44  ;;  %v275_v2 = vld [vmem:[%s1051_s3 + $0x18] sm:$0xff]  ;;  %v113_v3 = vld [vmem:[%s1049_s1 + $0x268] sm:$0xff]  ;;  %v130_v4 = vld [vmem:[%s1049_s1 + $0x2f0] sm:$0xff] }
  0x18   :  { %165 = vmatpush.msra.mxu1 %v57_v39  ;;  %143 = vmatpush.msra.mxu0 %v40_v41  ;;  %v85_v5 = vld [vmem:[%s1049_s1 + $0x188] sm:$0xff]  ;;  %v274_v6 = vld [vmem:[%s1051_s3 + $0x10] sm:$0xff]  ;;  %v112_v7 = vld [vmem:[%s1049_s1 + $0x260] sm:$0xff] }
  0x19   :  { %189 = vmatpush.msra.mxu2 %v72_v42  ;;  %210 = vmatpush.msra.mxu3 %v90_v48  ;;  %v129_v8 = vld [vmem:[%s1049_s1 + $0x2e8] sm:$0xff]  ;;  %v84_v9 = vld [vmem:[%s1049_s1 + $0x180] sm:$0xff]  ;;  %v111_v12 = vld [vmem:[%s1049_s1 + $0x258] sm:$0xff] }
  0x1a   :  { %166 = vmatpush.msra.mxu1 %v56_v43  ;;  %144 = vmatpush.msra.mxu0 %v39_v45  ;;  %v273_v10 = vld [vmem:[%s1051_s3 + $0x8] sm:$0xff]  ;;  %v32_v11 = vld [vmem:[%s1048_s0 + $0x40] sm:$0x1] }
  0x1b   :  { %190 = vmatpush.msra.mxu2 %v71_v46  ;;  %211 = vmatpush.msra.mxu3 %v89_v52 }
  0x1c   :  { %167 = vmatpush.msra.mxu1 %v55_v47  ;;  %145 = vmatpush.msra.mxu0 %v38_v49 }
  0x1d   :  { %191 = vmatpush.msra.mxu2 %v70_v50  ;;  %212 = vmatpush.msra.mxu3 %v88_v56 }
  0x1e   :  { %168 = vmatpush.msra.mxu1 %v54_v51  ;;  %146 = vmatpush.msra.mxu0 %v37_v53 }
  0x1f   :  { %192 = vmatpush.msra.mxu2 %v69_v54  ;;  %213 = vmatpush.msra.mxu3 %v87_v62 }
  0x20   :  { %169 = vmatpush.msra.mxu1 %v53_v55  ;;  %147 = vmatpush.msra.mxu0 %v36_v57 }
  0x21   :  { %193 = vmatpush.msra.mxu2 %v68_v58  ;;  %214 = vmatpush.msra.mxu3 %v86_v1 }
  0x22   :  { %194 = vmatmul.f32.vlgmr.msra.gmra.mxu2 %v26_v59  ;;  %224 = vmatpush.msrb.mxu0 %v115_v60 }
  0x23   :  { %170 = vmatpush.msra.mxu1 %v52_v61  ;;  %295 = vmatpush.msrb.mxu2 %v275_v2 }
  0x24   :  { %225 = vmatpush.msrb.mxu0 %v114_v63  ;;  %215 = vmatpush.msra.mxu3 %v85_v5 }
  0x25   :  { %247 = vmatpush.msrb.mxu1 %v131_v0  ;;  %296 = vmatpush.msrb.mxu2 %v274_v6 }
  0x26   :  { %226 = vmatpush.msrb.mxu0 %v113_v3 }
  0x27   :  { %248 = vmatpush.msrb.mxu1 %v130_v4 }
  0x28   :  { %13 = vsyncpa [#allocation3], 0  ;;  %227 = vmatpush.msrb.mxu0 %v112_v7  ;;  %v128_v13 = vld [vmem:[%s1049_s1 + $0x2e0] sm:$0xff]  ;;  %v27_v14 = vld [vmem:[%s1048_s0 + $0x18] sm:$0xff]  ;;  %216 = vmatpush.msra.mxu3 %v84_v9  ;;  %vm276_vm0 = vcmask 261120   ;;  %vm311_vm1 = vcmask 253952  }
  0x29   :  { %249 = vmatpush.msrb.mxu1 %v129_v8  ;;  %v110_v15 = vld [vmem:[%s1049_s1 + $0x250] sm:$0xff]  ;;  %297 = vmatpush.msrb.mxu2 %v273_v10  ;;  %v25_v16 = vld [vmem:[%s1048_s0 + $0x8] sm:$0xff]  ;;  %v127_v17 = vld [vmem:[%s1049_s1 + $0x2d8] sm:$0xff]  ;;  %vm370_vm14 = vcmask 1040384   ;;  %vm422_vm15 = vcmask 1041408   ;;  %s532_s9 = sshll.u32 %s1054_s6, 4  ;;  %s533_s9 = int_to_ptr.hbm [resolvable:$true] %s532_s9 }
  0x2a   :  { %197 = vmatmul.f32.gmra.mxu2 %v32_v11  ;;  %228 = vmatpush.msrb.mxu0 %v111_v12  ;;  %v24_v18 = vld [vmem:[%s1048_s0] sm:$0xff]  ;;  %v109_v19 = vld [vmem:[%s1049_s1 + $0x248] sm:$0xff]  ;;  %v126_v21 = vld [vmem:[%s1049_s1 + $0x2d0] sm:$0xff]  ;;  %s521_s11 = sshll.u32 %s1053_s5, 4  ;;  %s628_s14 = smov [#allocation2]   ;;  %s522_s11 = int_to_ptr.hbm [resolvable:$true] %s521_s11 }
  0x2b   :  { %250 = vmatpush.msrb.mxu1 %v128_v13  ;;  %217 = vmatmul.f32.vlgmr.msra.gmra.mxu3 %v27_v14  ;;  %v272_v20 = vld [vmem:[%s1051_s3] sm:$0xff]  ;;  %v125_v23 = vld [vmem:[%s1049_s1 + $0x2c8] sm:$0xff]  ;;  %v107_v24 = vld [vmem:[%s1049_s1 + $0x238] sm:$0xff] }
  0x2c   :  { %229 = vmatpush.msrb.mxu0 %v110_v15  ;;  %171 = vmatmul.f32.vlgmr.msra.gmra.mxu1 %v25_v16  ;;  %v108_v22 = vld [vmem:[%s1049_s1 + $0x240] sm:$0xff]  ;;  %v33_v27 = vld [vmem:[%s1048_s0 + $0x48] sm:$0x1]  ;;  %v106_v28 = vld [vmem:[%s1049_s1 + $0x230] sm:$0xff] }
  0x2d   :  { %251 = vmatpush.msrb.mxu1 %v127_v17  ;;  %148 = vmatmul.f32.vlgmr.msra.gmra.mxu0 %v24_v18  ;;  %v270_v25 = vld [vmem:[%s1050_s2] sm:$0xff]  ;;  %v31_v29 = vld [vmem:[%s1048_s0 + $0x38] sm:$0x1]  ;;  %v30_v31 = vld [vmem:[%s1048_s0 + $0x30] sm:$0x1] }
  0x2e   :  { %230 = vmatpush.msrb.mxu0 %v109_v19  ;;  %298 = vmatpush.msrb.mxu2 %v272_v20  ;;  %v124_v26 = vld [vmem:[%s1049_s1 + $0x2c0] sm:$0xff]  ;;  %v123_v30 = vld [vmem:[%s1049_s1 + $0x2b8] sm:$0xff]  ;;  %v105_v32 = vld [vmem:[%s1049_s1 + $0x228] sm:$0xff] }
  0x2f   :  { %252 = vmatpush.msrb.mxu1 %v126_v21  ;;  %v122_v33 = vld [vmem:[%s1049_s1 + $0x2b0] sm:$0xff]  ;;  %v104_v34 = vld [vmem:[%s1049_s1 + $0x220] sm:$0xff]  ;;  %v121_v35 = vld [vmem:[%s1049_s1 + $0x2a8] sm:$0xff] }
  0x30   :  { %231 = vmatpush.msrb.mxu0 %v108_v22  ;;  %v103_v36 = vld [vmem:[%s1049_s1 + $0x218] sm:$0xff]  ;;  %v271_v37 = vld [vmem:[%s1050_s2 + $0x8] sm:$0x1]  ;;  %v120_v38 = vld [vmem:[%s1049_s1 + $0x2a0] sm:$0xff] }
  0x31   :  { %253 = vmatpush.msrb.mxu1 %v125_v23  ;;  %v102_v39 = vld [vmem:[%s1049_s1 + $0x210] sm:$0xff]  ;;  %v119_v40 = vld [vmem:[%s1049_s1 + $0x298] sm:$0xff]  ;;  %v101_v41 = vld [vmem:[%s1049_s1 + $0x208] sm:$0xff] }
  0x32   :  { %232 = vmatpush.msrb.mxu0 %v107_v24  ;;  %547 = vmatmul.msk.f32.vlgmr.msrb.gmra.mxu2 %vm276_vm0, %v270_v25  ;;  %v118_v42 = vld [vmem:[%s1049_s1 + $0x290] sm:$0xff]  ;;  %v100_v43 = vld [vmem:[%s1049_s1 + $0x200] sm:$0xff]  ;;  %v117_v44 = vld [vmem:[%s1049_s1 + $0x288] sm:$0xff] }
  0x33   :  { %254 = vmatpush.msrb.mxu1 %v124_v26  ;;  %220 = vmatmul.f32.gmra.mxu3 %v33_v27  ;;  %v28_v45 = vld [vmem:[%s1048_s0 + $0x20] sm:$0xff]  ;;  %v29_v47 = vld [vmem:[%s1048_s0 + $0x28] sm:$0xff]  ;;  %v34_v48 = vld [vmem:[%s1048_s0 + $0x50] sm:$0x1] }
  0x34   :  { %233 = vmatpush.msrb.mxu0 %v106_v28  ;;  %174 = vmatmul.f32.gmra.mxu1 %v31_v29  ;;  %v116_v46 = vld [vmem:[%s1049_s1 + $0x280] sm:$0xff]  ;;  %v35_v49 = vld [vmem:[%s1048_s0 + $0x58] sm:$0x1]  ;;  %s623_s0 = smov 119  }
  0x35   :  { %255 = vmatpush.msrb.mxu1 %v123_v30  ;;  %151 = vmatmul.f32.gmra.mxu0 %v30_v31 }
  0x36   :  { %234 = vmatpush.msrb.mxu0 %v105_v32 }
  0x37   :  { %256 = vmatpush.msrb.mxu1 %v122_v33 }
  0x38   :  { %235 = vmatpush.msrb.mxu0 %v104_v34 }
  0x39   :  { %257 = vmatpush.msrb.mxu1 %v121_v35 }
  0x3a   :  { %236 = vmatpush.msrb.mxu0 %v103_v36  ;;  %548 = vmatmul.msk.f32.gmra.mxu2 %vm276_vm0, %v271_v37 }
  0x3b   :  { %258 = vmatpush.msrb.mxu1 %v120_v38 }
  0x3c   :  { %237 = vmatpush.msrb.mxu0 %v102_v39 }
  0x3d   :  { %259 = vmatpush.msrb.mxu1 %v119_v40 }
  0x3e   :  { %238 = vmatpush.msrb.mxu0 %v101_v41 }
  0x3f   :  { %260 = vmatpush.msrb.mxu1 %v118_v42 }
  0x40   :  { %239 = vmatpush.msrb.mxu0 %v100_v43 }
  0x41   :  { %261 = vmatpush.msrb.mxu1 %v117_v44  ;;  %240 = vmatmul.f32.vlgmr.msrb.gmra.mxu0 %v28_v45 }
  0x43   :  { %262 = vmatpush.msrb.mxu1 %v116_v46 }
  0x44   :  { %263 = vmatmul.f32.vlgmr.msrb.gmra.mxu1 %v29_v47 }
  0x49   :  { %243 = vmatmul.f32.gmra.mxu0 %v34_v48 }
  0x4c   :  { %266 = vmatmul.f32.gmra.mxu1 %v35_v49 }
  0xa5   :  { %v195_v50 = vpop.f32.mrf.mxu2 }
  0xa9   :  { %v172_v53 = vpop.f32.mrf.mxu1 }
  0xaa   :  { %v149_v51 = vpop.f32.mrf.mxu0 }
  0xab   :  { %v173_v55 = vadd.f32 %v172_v53, %v149_v51 }
  0xad   :  { %v198_v52 = vpop.f32.mrf.mxu2  ;;  %v196_v58 = vadd.f32 %v195_v50, %v173_v55 }
  0xae   :  { %v218_v57 = vpop.f32.mrf.mxu3 }
  0xaf   :  { %v219_v60 = vadd.f32 %v218_v57, %v196_v58 }
  0xb1   :  { %v175_v59 = vpop.f32.mrf.mxu1 }
  0xb2   :  { %v152_v54 = vpop.f32.mrf.mxu0 }
  0xb3   :  { %v176_v61 = vadd.f32 %v175_v59, %v152_v54 }
  0xb5   :  { %v1008_v56 = vpop.f32.mrf.mxu2  ;;  %v199_v3 = vadd.f32 %v198_v52, %v176_v61 }
  0xb6   :  { %v337_v5 = vmul.f32 %v1008_v56, %v1008_v56  ;;  %v221_v6 = vpop.f32.mrf.mxu3 }
  0xb7   :  { %v222_v9 = vadd.f32 %v221_v6, %v199_v3 }
  0xb8   :  { %v339_v12 = vsel %vm276_vm0, %v337_v5, 0.0 }
  0xbd   :  { %v1010_v62 = vpop.f32.mrf.mxu2 }
  0xbe   :  { %v338_v63 = vmul.f32 %v1010_v62, %v1010_v62  ;;  %v241_v0 = vpop.f32.mrf.mxu0 }
  0xbf   :  { %v242_v1 = vadd.f32 %v241_v0, %v219_v60 }
  0xc0   :  { %v342_v2 = vsel %vm311_vm1, %v338_v63, 0.0 }
  0xc1   :  { %v264_v4 = vpop.f32.mrf.mxu1  ;;  %343 = vadd.xlane.f32.xlu1 %v342_v2 }
  0xc2   :  { %v265_v7 = vadd.f32 %v264_v4, %v242_v1 }
  0xc4   :  { %v306_v8 = vmul.f32 %v265_v7, %v265_v7 }
  0xc6   :  { %v244_v10 = vpop.f32.mrf.mxu0  ;;  %v308_v11 = vsel %vm276_vm0, %v306_v8, 0.0 }
  0xc7   :  { %v245_v13 = vadd.f32 %v244_v10, %v222_v9  ;;  %309 = vadd.xlane.f32.xlu0 %v308_v11 }
  0xc9   :  { %v267_v14 = vpop.f32.mrf.mxu1  ;;  %340 = vadd.xlane.f32.xlu1 %v339_v12 }
  0xca   :  { %v268_v15 = vadd.f32 %v267_v14, %v245_v13 }
  0xcc   :  { %v307_v16 = vmul.f32 %v268_v15, %v268_v15 }
  0xce   :  { %v312_v17 = vsel %vm311_vm1, %v307_v16, 0.0 }
  0xcf   :  { %313 = vadd.xlane.f32.xlu0 %v312_v17 }
 0x134   :  { %v344_v18 = vpop.xlane.xlu1 %343 }
 0x135   :  { %565 = vrsqrt.f32 %v344_v18  ;;  %vm361_vm6 = vweird.f32 %v344_v18 }
 0x13a   :  { %v310_v19 = vpop.xlane.xlu0 %309 }
 0x13b   :  { %567 = vrsqrt.f32 %v310_v19  ;;  %v566_v21 = vpop.eup %565  ;;  %vm321_vm3 = vweird.f32 %v310_v19 }
 0x13c   :  { %v341_v20 = vpop.xlane.xlu1 %340  ;;  %v356_v26 = vmul.f32 %v566_v21, %v344_v18  ;;  %vm362_vm7 = vweird.f32 %v566_v21 }
 0x13d   :  { %569 = vrsqrt.f32 %v341_v20  ;;  %vm363_vm10 = vmor %vm361_vm6, %vm362_vm7  ;;  %vm351_vm12 = vweird.f32 %v341_v20 }
 0x13e   :  { %v357_v30 = vmul.f32 %v566_v21, %v356_v26 }
 0x140   :  { %v358_v35 = vmul.f32 0.5, %v357_v30 }
 0x141   :  { %v568_v22 = vpop.eup %567 }
 0x142   :  { %v316_v23 = vmul.f32 %v568_v22, %v310_v19  ;;  %v314_v24 = vpop.xlane.xlu0 %313  ;;  %vm322_vm2 = vweird.f32 %v568_v22  ;;  %v359_v40 = vsub.f32 1.5, %v358_v35 }
 0x143   :  { %v570_v25 = vpop.eup %569  ;;  %571 = vrsqrt.f32 %v314_v24  ;;  %vm323_vm4 = vmor %vm321_vm3, %vm322_vm2  ;;  %vm331_vm8 = vweird.f32 %v314_v24 }
 0x144   :  { %v317_v27 = vmul.f32 %v568_v22, %v316_v23  ;;  %v346_v28 = vmul.f32 %v570_v25, %v341_v20  ;;  %v360_v46 = vmul.f32 %v566_v21, %v359_v40  ;;  %vm352_vm11 = vweird.f32 %v570_v25 }
 0x145   :  { %vm353_vm13 = vmor %vm351_vm12, %vm352_vm11 }
 0x146   :  { %v318_v29 = vmul.f32 0.5, %v317_v27  ;;  %v347_v33 = vmul.f32 %v570_v25, %v346_v28  ;;  %v364_v52 = vsel %vm363_vm10, %v566_v21, %v360_v46 }
 0x147   :  { %v366_v55 = vmul.f32 %v364_v52, %v1010_v62 }
 0x148   :  { %v319_v31 = vsub.f32 1.5, %v318_v29  ;;  %v348_v38 = vmul.f32 0.5, %v347_v33 }
 0x149   :  { %v572_v32 = vpop.eup %571 }
 0x14a   :  { %v326_v34 = vmul.f32 %v572_v32, %v314_v24  ;;  %v320_v36 = vmul.f32 %v568_v22, %v319_v31  ;;  %vm332_vm5 = vweird.f32 %v572_v32  ;;  %v349_v43 = vsub.f32 1.5, %v348_v38 }
 0x14b   :  { %vm333_vm9 = vmor %vm331_vm8, %vm332_vm5  ;;  %v488_v31 = vlaneseq  ;;  %vm494_vm8 = vcmask 65536  }
 0x14c   :  { %v327_v37 = vmul.f32 %v572_v32, %v326_v34  ;;  %v324_v41 = vsel %vm323_vm4, %v568_v22, %v320_v36  ;;  %v350_v48 = vmul.f32 %v570_v25, %v349_v43  ;;  %vm451_vm4 = vcmask 67584  }
 0x14d   :  { %v335_v45 = vmul.f32 %v324_v41, %v265_v7  ;;  %v624_v43 = vmov 0.04  }
 0x14e   :  { %v328_v39 = vmul.f32 0.5, %v327_v37  ;;  %v354_v54 = vsel %vm353_vm13, %v570_v25, %v350_v48 }
 0x14f   :  { %v374_v50 = vrot.slane %v335_v45, 7  ;;  %v365_v57 = vmul.f32 %v354_v54, %v1008_v56 }
 0x150   :  { %v329_v42 = vsub.f32 1.5, %v328_v39  ;;  %v489_v39 = vand.u32 127, %v488_v31 }
 0x151   :  { %v378_v58 = vsel %vm370_vm14, %v366_v55, %v374_v50  ;;  %v368_v59 = vrot.slane %v365_v57, 7  ;;  %v627_v55 = vmov 8.0  }
 0x152   :  { %v330_v44 = vmul.f32 %v572_v32, %v329_v42  ;;  %vm490_vm7 = vcmp.ge.s32.totalorder %v489_v39, 1 }
 0x153   :  { %v371_v60 = vsel %vm370_vm14, %v335_v45, %v368_v59 }
 0x154   :  { %v334_v47 = vsel %vm333_vm9, %v572_v32, %v330_v44  ;;  %v453_v32 = vld [vmem:[%s1052_s4] sm:$0x1]  ;;  %s626_s4 = smov [#allocation5]  }
 0x155   :  { %v336_v49 = vmul.f32 %v334_v47, %v268_v15  ;;  %vm454_vm5 = vcmp.eq.f32.partialorder %v453_v32, 1.0  ;;  %s530_s30 = sshll.u32 %s626_s4, 4  ;;  %s531_s30 = int_to_ptr.vmem [resolvable:$true] %s530_s30 }
 0x156   :  { %v455_v44 = vsel %vm454_vm5, 0.96, %v624_v43 }
 0x157   :  { %v375_v51 = vrot.slane %v336_v49, 7 }
 0x159   :  { %v376_v53 = vsel %vm370_vm14, %v374_v50, %v375_v51  ;;  %v625_v50 = vmov 0.0  }
 0x15a   :  { %549 = vmatpush.xpose.msk.msrb.mxu3 %vm276_vm0, %v376_v53  ;;  %v554_v51 = vsel %vm490_vm7, 1.0, %v625_v50 }
 0x15e   :  { %550 = vmatpush.xpose.msk.msrb.mxu3 %vm276_vm0, %v378_v58 }
 0x162   :  { %551 = vmatpush.xpose.msk.msrb.mxu3 %vm276_vm0, %v365_v57 }
 0x165   :  { %552 = vmatmul.msk.f32.vlgmr.msrb.gmra.mxu3 %vm276_vm0, %v371_v60 }
 0x1e8   :  { %v406_v61 = vpop.f32.mrf.mxu3 }
 0x1e9   :  { %v410_v63 = vrot.slane %v406_v61, 1 }
 0x1eb   :  { %411 = vrot.lane.b32.xlu2 %v410_v63, %s623_s0 }
 0x1f3   :  { %415 = vrot.lane.b32.xlu2 %v406_v61, %s623_s0 }
 0x245   :  { %v412_v0 = vpop.permute.xlu2 %411 }
 0x246   :  { %v1029_v62 = vadd.f32 %v412_v0, %v406_v61 }
 0x248   :  { %v419_v56 = vrot.slane %v1029_v62, 6  ;;  %v470_v6 = vand.u32 2147483647, %v1029_v62  ;;  %v467_v36 = vmax.f32 %v1029_v62, 0.0  ;;  %v468_v37 = vmul.f32 %v453_v32, %v1029_v62 }
 0x24a   :  { %v471_v8 = vsub.f32 0.0, %v470_v6  ;;  %v469_v46 = vsub.f32 %v467_v36, %v468_v37 }
 0x24c   :  { %v472_v9 = vmul.f32 1.442695, %v471_v8 }
 0x24d   :  { %v416_v1 = vpop.permute.xlu2 %415 }
 0x24e   :  { %v421_v2 = vsel %vm370_vm14, %v406_v61, %v416_v1 }
 0x24f   :  { %v423_v3 = vsel %vm422_vm15, %v421_v2, %v419_v56 }
 0x250   :  { %v553_v4 = vmul.f32 -1.442695, %v423_v3 }
 0x252   :  { %573 = vpow2.f32 %v553_v4 }
 0x258   :  { %v574_v5 = vpop.eup %573 }
 0x259   :  { %v427_v7 = vadd.f32 1.0, %v574_v5 }
 0x25b   :  { %575 = vrcp.f32 %v427_v7  ;;  %v439_v13 = vand.u32 2147483648, %v427_v7  ;;  %v437_v15 = vand.u32 2147483647, %v427_v7  ;;  %vm433_vm1 = vweird.f32 %v427_v7 }
 0x25c   :  { %577 = vpow2.f32 %v472_v9 }
 0x25d   :  { %v440_v17 = vor.u32 1.1754944e-38, %v439_v13  ;;  %vm438_vm3 = vcmp.eq.f32.partialorder %v437_v15, 8.507059e+37 }
 0x261   :  { %v576_v10 = vpop.eup %575 }
 0x262   :  { %v429_v11 = vmul.f32 %v576_v10, %v427_v7  ;;  %vm434_vm0 = vweird.f32 %v576_v10  ;;  %v578_v18 = vpop.eup %577 }
 0x263   :  { %vm435_vm2 = vmor %vm433_vm1, %vm434_vm0  ;;  %v474_v22 = vadd.f32 1.0, %v578_v18  ;;  %v477_v29 = vmul.f32 -0.5, %v578_v18  ;;  %v480_v34 = vand.u32 2147483647, %v578_v18 }
 0x264   :  { %v430_v12 = vsub.f32 1.0, %v429_v11 }
 0x265   :  { %579 = vlog2.f32 %v474_v22  ;;  %v478_v33 = vadd.f32 1.0, %v477_v29  ;;  %vm481_vm6 = vcmp.lt.f32.partialorder %v480_v34, 0.0004427343 }
 0x266   :  { %v431_v14 = vmul.f32 %v576_v10, %v430_v12  ;;  %581 = vrcp.f32 %v627_v55 }
 0x267   :  { %v479_v41 = vmul.f32 %v578_v18, %v478_v33 }
 0x268   :  { %v432_v16 = vadd.f32 %v576_v10, %v431_v14 }
 0x26a   :  { %v436_v19 = vsel %vm435_vm2, %v576_v10, %v432_v16 }
 0x26b   :  { %v441_v20 = vsel %vm438_vm3, %v440_v17, %v436_v19  ;;  %v580_v30 = vpop.eup %579 }
 0x26c   :  { %457 = vst [vmem:[#allocation1] sm:$0xff] %v441_v20  ;;  %v444_v21 = vrot.slane %v441_v20, 1  ;;  %v447_v24 = vrot.slane %v441_v20, 7  ;;  %v456_v27 = vsub.f32 1.0, %v441_v20  ;;  %v476_v35 = vmul.f32 0.6931472, %v580_v30  ;;  %v582_v57 = vpop.eup %581 }
 0x26d   :  { %v506_v58 = vmul.f32 8.0, %v582_v57  ;;  %vm510_vm9 = vweird.f32 %v582_v57 }
 0x26e   :  { %v446_v23 = vadd.f32 %v444_v21, %v441_v20  ;;  %v482_v45 = vsel %vm481_vm6, %v479_v41, %v476_v35 }
 0x26f   :  { %v483_v48 = vadd.f32 %v482_v45, %v469_v46  ;;  %v507_v59 = vsub.f32 1.0, %v506_v58 }
 0x270   :  { %v449_v25 = vsel %vm370_vm14, %v446_v23, %v447_v24 }
 0x271   :  { %v450_v26 = vsel %vm422_vm15, %v449_v25, %v447_v24  ;;  %v508_v0 = vmul.f32 %v582_v57, %v507_v59 }
 0x272   :  { %452 = vst.msk [vmem:[#allocation5] sm:$0x7] %vm451_vm4, %v450_v26 }
 0x273   :  { %v459_v28 = vld [vmem:[#allocation1 + $0x2] ss:$9 sm:$0xff]  ;;  %535 = dma.vmem_to_hbm [thread:$0]  %s531_s30, 64, %s533_s9, [#allocation3]   ;;  %v509_v1 = vadd.f32 %v582_v57, %v508_v0 }
 0x274   :  { %462 = vst [vmem:[#allocation1] sm:$0xff] %v456_v27 }
 0x275   :  { %v511_v4 = vsel %vm510_vm9, %v582_v57, %v509_v1 }
 0x27b   :  { %v464_v38 = vld [vmem:[#allocation1 + $0x2] ss:$9 sm:$0xff] }
 0x27c   :  { %v466_v40 = vsel %vm454_vm5, %v459_v28, %v464_v38 }
 0x27d   :  { %v484_v42 = vsub.f32 1.0, %v466_v40 }
 0x27f   :  { %v485_v47 = vmul.f32 %v484_v42, %v484_v42 }
 0x281   :  { %v486_v49 = vmul.f32 %v485_v47, %v455_v44 }
 0x283   :  { %v487_v52 = vmul.f32 %v486_v49, %v483_v48 }
 0x285   :  { %v493_v53 = vmul.f32 %v554_v51, %v487_v52 }
 0x287   :  { %v495_v54 = vsel %vm494_vm8, %v493_v53, 0.0 }
 0x288   :  { %496 = vadd.xlane.f32.xlu0 %v495_v54 }
 0x2fb   :  { %v497_v60 = vpop.xlane.xlu0 %496 }
 0x2fc   :  { %v498_v61 = vrot.slane %v497_v60, 4 }
 0x2fe   :  { %v499_v63 = vadd.f32 %v498_v61, %v497_v60 }
 0x300   :  { %v500_v62 = vrot.slane %v499_v63, 2 }
 0x302   :  { %v501_v56 = vadd.f32 %v500_v62, %v499_v63 }
 0x304   :  { %v502_v2 = vrot.slane %v501_v56, 1 }
 0x306   :  { %v503_v3 = vadd.f32 %v502_v2, %v501_v56 }
 0x308   :  { %555 = vpush %v503_v3 }
 0x309   :  { %557 = vpush %v511_v4 }
 0x339   :  { %s556_s12 = spop %555 }
 0x33a   :  { %s558_s13 = spop %557 }
 0x33b   :  { %s513_s2 = smul.f32 %s558_s13, %s556_s12 }
 0x33d   :  { %515 = sst [smem:[#allocation2]] %s513_s2 }
 0x33e   :  { %524 = dma.smem_to_hbm %s628_s14, 16, %s522_s11, [#allocation4]  }
 0x33f   :  { %619 = dma.done.wait [#allocation4], 16  }
 0x340   :  { %620 = vsyncadd [#allocation4], 4294967280 }
 0x341   :  { %621 = dma.done.wait [#allocation3], 64  }
 0x342   :  { %622 = vsyncadd [#allocation3], 4294967232 }
 0x343   :  { %544 = sfence }
 0x344   :  { %545 = vsyncpa [#allocation3], 1 }
 0x345   :  { %546 = vsyncpa [#allocation4], 1 }

</bundles_post_ra>
